<compile_context>
chip_gen: v5e
topology: v5e:2x2
jax: 0.10.0
libtpu: 0.0.40
codegen_flags: <defaults>
</compile_context>

<pallas_src>
import functools

import jax
import jax.numpy as jnp
import numpy as np
from jax.experimental import pallas as pl
from jax.experimental.pallas import tpu as pltpu

PHYSI_IN = 76
VITAL_IN = 128
LANE = 128


def _round_up(x, m):
    return (x + m - 1) // m * m


def _make_kernel(apply_dropout: bool):
    def body(physi_ref, vital_ref, wp_ref, bp_ref, wv_ref, bv_ref,
             wc_ref, bc_ref, out_ref, mask_ref=None):
        # physi branch: tanh(physi @ Wp + bp)   (f32 accumulation, f32 tanh)
        p_h = jnp.tanh(
            jnp.dot(physi_ref[...], wp_ref[...],
                    preferred_element_type=jnp.float32) + bp_ref[...])
        # vital branch: tanh(vital @ Wv + bv)
        v_h = jnp.tanh(
            jnp.dot(vital_ref[...], wv_ref[...],
                    preferred_element_type=jnp.float32) + bv_ref[...])

        # fusion = concat([physi_out, vital_out], -1)  (torch.concat order)
        fused = jnp.concatenate([p_h, v_h], axis=-1)

        if mask_ref is not None:
            # inverted-dropout mask (already scaled by 1/keep_prob), f32 math
            fused = fused * mask_ref[...]

        # single classifier matmul over the merged hidden dim
        out_ref[...] = (
            jnp.dot(fused.astype(wc_ref.dtype), wc_ref[...],
                    preferred_element_type=jnp.float32) + bc_ref[...])

    if apply_dropout:
        def kernel(physi_ref, vital_ref, mask_ref,
                   wp_ref, bp_ref, wv_ref, bv_ref, wc_ref, bc_ref, out_ref):
            body(physi_ref, vital_ref, wp_ref, bp_ref, wv_ref, bv_ref,
                 wc_ref, bc_ref, out_ref, mask_ref)
    else:
        def kernel(physi_ref, vital_ref,
                   wp_ref, bp_ref, wv_ref, bv_ref, wc_ref, bc_ref, out_ref):
            body(physi_ref, vital_ref, wp_ref, bp_ref, wv_ref, bv_ref,
                 wc_ref, bc_ref, out_ref, None)

    return kernel


def prepare_params(params, compute_dtype=jnp.float32):
    """One-time weight prep (hoisted out of the per-step wrapper).

    - classes padded to a multiple of 128 lanes (lane-dense output store)
    - biases reshaped to [1, H] broadcast rows, kept f32
    - matmul operands cast to `compute_dtype` (bf16 recommended on v6e/v7x)
    """
    Hp = params["wp"].shape[1]
    Hv = params["wv"].shape[1]
    C = params["wc"].shape[1]
    C_pad = _round_up(C, LANE)

    wc = jnp.pad(params["wc"], ((0, 0), (0, C_pad - C)))
    bc = jnp.pad(params["bc"], (0, C_pad - C)).reshape(1, C_pad)

    return {
        "wp": params["wp"].astype(compute_dtype),      # [76,  Hp]
        "bp": params["bp"].reshape(1, Hp).astype(jnp.float32),
        "wv": params["wv"].astype(compute_dtype),      # [128, Hv]
        "bv": params["bv"].reshape(1, Hv).astype(jnp.float32),
        "wc": wc.astype(compute_dtype),                # [Hp+Hv, C_pad]
        "bc": bc.astype(jnp.float32),                  # [1, C_pad]
    }


@functools.partial(
    jax.jit, static_argnames=("n_classes", "training", "drop_p", "block_b"))
def physi_vital_forward(physi_feat, vital_feat, prepared, dropout_key=None, *,
                        n_classes, training=False, drop_p=0.3, block_b=512):
    """Fused forward pass of PhysiVitalModel (physi/vital submodules = identity)."""
    B = physi_feat.shape[0]
    compute_dtype = prepared["wp"].dtype
    Hp = prepared["wp"].shape[1]
    Hv = prepared["wv"].shape[1]
    Htot = Hp + Hv
    C_pad = prepared["wc"].shape[1]

    # ---- batch tiling: pad rows to sublane/tile multiples ----
    B_pad = _round_up(B, 8)
    if B_pad > block_b:
        TB = block_b
        B_pad = _round_up(B_pad, TB)
    else:
        TB = B_pad
    grid = (B_pad // TB,)

    def pad_rows(x):
        return jnp.pad(x, ((0, B_pad - B), (0, 0))) if B_pad != B else x

    physi = pad_rows(physi_feat.astype(compute_dtype))
    vital = pad_rows(vital_feat.astype(compute_dtype))

    apply_dropout = bool(training) and drop_p > 0.0

    inputs = [physi, vital]
    act_specs = [
        pl.BlockSpec((TB, PHYSI_IN), lambda i: (i, 0)),
        pl.BlockSpec((TB, VITAL_IN), lambda i: (i, 0)),
    ]
    if apply_dropout:
        if dropout_key is None:
            raise ValueError("training=True with drop_p>0 requires dropout_key")
        keep_prob = 1.0 - drop_p
        keep = jax.random.bernoulli(dropout_key, keep_prob, (B_pad, Htot))
        mask = keep.astype(jnp.float32) * np.float32(1.0 / keep_prob)
        inputs.append(mask)
        act_specs.append(pl.BlockSpec((TB, Htot), lambda i: (i, 0)))

    # weights: single block, pinned to (0, 0) -> VMEM-resident across grid steps
    w_specs = [
        pl.BlockSpec((PHYSI_IN, Hp), lambda i: (0, 0)),
        pl.BlockSpec((1, Hp), lambda i: (0, 0)),
        pl.BlockSpec((VITAL_IN, Hv), lambda i: (0, 0)),
        pl.BlockSpec((1, Hv), lambda i: (0, 0)),
        pl.BlockSpec((Htot, C_pad), lambda i: (0, 0)),
        pl.BlockSpec((1, C_pad), lambda i: (0, 0)),
    ]
    inputs += [prepared["wp"], prepared["bp"], prepared["wv"],
               prepared["bv"], prepared["wc"], prepared["bc"]]

    # advisory cost estimate for XLA scheduling
    itemsize = jnp.dtype(compute_dtype).itemsize
    flops = 2 * B_pad * (PHYSI_IN * Hp + VITAL_IN * Hv + Htot * C_pad)
    bytes_accessed = (
        B_pad * (PHYSI_IN + VITAL_IN) * itemsize            # activations in
        + (PHYSI_IN * Hp + VITAL_IN * Hv + Htot * C_pad) * itemsize  # weights
        + (Hp + Hv + C_pad) * 4                              # biases
        + B_pad * C_pad * 4)                                 # output
    if apply_dropout:
        bytes_accessed += B_pad * Htot * 4
    cost = pl.CostEstimate(flops=int(flops),
                           transcendentals=int(B_pad * Htot),
                           bytes_accessed=int(bytes_accessed))

    out = pl.pallas_call(
        _make_kernel(apply_dropout),
        out_shape=jax.ShapeDtypeStruct((B_pad, C_pad), jnp.float32),
        grid=grid,
        in_specs=act_specs + w_specs,
        out_specs=pl.BlockSpec((TB, C_pad), lambda i: (i, 0)),
        compiler_params=pltpu.CompilerParams(
            dimension_semantics=("parallel",)),
        cost_estimate=cost,
    )(*inputs)

    return out[:B, :n_classes]


def init_params(key, config):
    """Weights stored as [in_features, out_features] (transpose of nn.Linear)."""
    Hp = config["physi_hidden"]
    Hv = config["vital_hidden"]
    Htot = config["total_hidden"]
    C = config["n_classes"]
    assert Htot == Hp + Hv
    ks = jax.random.split(key, 6)
    s = 0.02
    return {
        "wp": s * jax.random.normal(ks[0], (PHYSI_IN, Hp), jnp.float32),
        "bp": s * jax.random.normal(ks[1], (Hp,), jnp.float32),
        "wv": s * jax.random.normal(ks[2], (VITAL_IN, Hv), jnp.float32),
        "bv": s * jax.random.normal(ks[3], (Hv,), jnp.float32),
        "wc": s * jax.random.normal(ks[4], (Htot, C), jnp.float32),
        "bc": s * jax.random.normal(ks[5], (C,), jnp.float32),
    }


def reference_forward(physi_feat, vital_feat, params):
    # pure-JAX reference (eval mode: dropout is identity)
    p_h = jnp.tanh(physi_feat @ params["wp"] + params["bp"])
    v_h = jnp.tanh(vital_feat @ params["wv"] + params["bv"])
    fusion = jnp.concatenate([p_h, v_h], axis=-1)
    return fusion @ params["wc"] + params["bc"]


if __name__ == "__main__":
    config = {"physi_hidden": 32, "vital_hidden": 32,
              "total_hidden": 64, "n_classes": 8}
    B = 8

    key = jax.random.PRNGKey(0)
    k_physi, k_vital, k_params, k_drop = jax.random.split(key, 4)

    # physi/vital submodule outputs (identity submodules -> feature inputs)
    physi_feat = jax.random.normal(k_physi, (B, PHYSI_IN), jnp.float32)
    vital_feat = jax.random.normal(k_vital, (B, VITAL_IN), jnp.float32)
    params = init_params(k_params, config)
    ref = reference_forward(physi_feat, vital_feat, params)

    # 1) f32 path: exact match against pure-JAX reference (eval mode)
    prepared_f32 = prepare_params(params, compute_dtype=jnp.float32)
    out = jax.block_until_ready(
        physi_vital_forward(physi_feat, vital_feat, prepared_f32,
                            n_classes=config["n_classes"], training=False))
    np.testing.assert_allclose(np.asarray(out), np.asarray(ref),
                               rtol=1e-5, atol=1e-5)

    # 2) bf16 matmul-operand path (v6e/v7x-friendly), f32 accumulation
    prepared_bf16 = prepare_params(params, compute_dtype=jnp.bfloat16)
    out_bf16 = jax.block_until_ready(
        physi_vital_forward(physi_feat, vital_feat, prepared_bf16,
                            n_classes=config["n_classes"], training=False))
    np.testing.assert_allclose(np.asarray(out_bf16), np.asarray(ref),
                               rtol=5e-2, atol=5e-2)

    # 3) training-mode dropout path (mask from jax.random; vary key per step)
    out_train = jax.block_until_ready(
        physi_vital_forward(physi_feat, vital_feat, prepared_f32, k_drop,
                            n_classes=config["n_classes"], training=True,
                            drop_p=0.3))
    assert out_train.shape == (B, config["n_classes"])
    assert np.all(np.isfinite(np.asarray(out_train)))

    print("KERNEL_OK")
</pallas_src>

<mosaic_0001>
module attributes {stable_mosaic.version = 11 : i64} {
  func.func @kernel(%arg0: i32, %arg1: memref<8x76xf32, #tpu.memory_space<vmem>>, %arg2: memref<8x128xf32, #tpu.memory_space<vmem>>, %arg3: memref<76x32xf32, #tpu.memory_space<vmem>>, %arg4: memref<1x32xf32, #tpu.memory_space<vmem>>, %arg5: memref<128x32xf32, #tpu.memory_space<vmem>>, %arg6: memref<1x32xf32, #tpu.memory_space<vmem>>, %arg7: memref<64x128xf32, #tpu.memory_space<vmem>>, %arg8: memref<1x128xf32, #tpu.memory_space<vmem>>, %arg9: memref<8x128xf32, #tpu.memory_space<vmem>>) attributes {dimension_semantics = [#tpu.dimension_semantics<parallel>], iteration_bounds = array<i64: 1>, scalar_prefetch = 0 : i64, scratch_operands = 0 : i64, tpu.core_type = #tpu.core_type<tc>, window_params = [{transform_indices = @transform_0, window_bounds = array<i64: 8, 76>}, {transform_indices = @transform_1, window_bounds = array<i64: 8, 128>}, {pipeline_mode = #tpu.pipeline_mode<synchronous>, transform_indices = @transform_2, window_bounds = array<i64: 76, 32>}, {pipeline_mode = #tpu.pipeline_mode<synchronous>, transform_indices = @transform_3, window_bounds = array<i64: 1, 32>}, {pipeline_mode = #tpu.pipeline_mode<synchronous>, transform_indices = @transform_4, window_bounds = array<i64: 128, 32>}, {pipeline_mode = #tpu.pipeline_mode<synchronous>, transform_indices = @transform_5, window_bounds = array<i64: 1, 32>}, {pipeline_mode = #tpu.pipeline_mode<synchronous>, transform_indices = @transform_6, window_bounds = array<i64: 64, 128>}, {pipeline_mode = #tpu.pipeline_mode<synchronous>, transform_indices = @transform_7, window_bounds = array<i64: 1, 128>}, {transform_indices = @transform_8, window_bounds = array<i64: 8, 128>}]} {
    %c0 = arith.constant 0 : index
    %c0_0 = arith.constant 0 : index
    %0 = vector.load %arg1[%c0, %c0_0] : memref<8x76xf32, #tpu.memory_space<vmem>>, vector<8x76xf32>
    %c0_1 = arith.constant 0 : index
    %c0_2 = arith.constant 0 : index
    %1 = vector.load %arg3[%c0_1, %c0_2] : memref<76x32xf32, #tpu.memory_space<vmem>>, vector<76x32xf32>
    %cst = arith.constant dense<0.000000e+00> : vector<8x32xf32>
    %2 = tpu.matmul %0, %1, %cst {dimension_numbers = #tpu.dot_dimension_numbers<[1], [0], [0], [1], [0, 0, 1, 1], [], []>} : vector<8x76xf32>, vector<76x32xf32>, vector<8x32xf32> -> vector<8x32xf32>
    %c0_3 = arith.constant 0 : index
    %c0_4 = arith.constant 0 : index
    %3 = vector.load %arg4[%c0_3, %c0_4] : memref<1x32xf32, #tpu.memory_space<vmem>>, vector<1x32xf32>
    %4 = vector.broadcast %3 : vector<1x32xf32> to vector<8x32xf32>
    %5 = arith.addf %2, %4 : vector<8x32xf32>
    %6 = math.tanh %5 : vector<8x32xf32>
    %c0_5 = arith.constant 0 : index
    %c0_6 = arith.constant 0 : index
    %7 = vector.load %arg2[%c0_5, %c0_6] : memref<8x128xf32, #tpu.memory_space<vmem>>, vector<8x128xf32>
    %c0_7 = arith.constant 0 : index
    %c0_8 = arith.constant 0 : index
    %8 = vector.load %arg5[%c0_7, %c0_8] : memref<128x32xf32, #tpu.memory_space<vmem>>, vector<128x32xf32>
    %cst_9 = arith.constant dense<0.000000e+00> : vector<8x32xf32>
    %9 = tpu.matmul %7, %8, %cst_9 {dimension_numbers = #tpu.dot_dimension_numbers<[1], [0], [0], [1], [0, 0, 1, 1], [], []>} : vector<8x128xf32>, vector<128x32xf32>, vector<8x32xf32> -> vector<8x32xf32>
    %c0_10 = arith.constant 0 : index
    %c0_11 = arith.constant 0 : index
    %10 = vector.load %arg6[%c0_10, %c0_11] : memref<1x32xf32, #tpu.memory_space<vmem>>, vector<1x32xf32>
    %11 = vector.broadcast %10 : vector<1x32xf32> to vector<8x32xf32>
    %12 = arith.addf %9, %11 : vector<8x32xf32>
    %13 = math.tanh %12 : vector<8x32xf32>
    %14 = tpu.concatenate %6, %13 in 1 : vector<8x32xf32>, vector<8x32xf32> -> vector<8x64xf32>
    %c0_12 = arith.constant 0 : index
    %c0_13 = arith.constant 0 : index
    %15 = vector.load %arg7[%c0_12, %c0_13] : memref<64x128xf32, #tpu.memory_space<vmem>>, vector<64x128xf32>
    %cst_14 = arith.constant dense<0.000000e+00> : vector<8x128xf32>
    %16 = tpu.matmul %14, %15, %cst_14 {dimension_numbers = #tpu.dot_dimension_numbers<[1], [0], [0], [1], [0, 0, 1, 1], [], []>} : vector<8x64xf32>, vector<64x128xf32>, vector<8x128xf32> -> vector<8x128xf32>
    %c0_15 = arith.constant 0 : index
    %c0_16 = arith.constant 0 : index
    %17 = vector.load %arg8[%c0_15, %c0_16] : memref<1x128xf32, #tpu.memory_space<vmem>>, vector<1x128xf32>
    %18 = vector.broadcast %17 : vector<1x128xf32> to vector<8x128xf32>
    %19 = arith.addf %16, %18 : vector<8x128xf32>
    %c0_17 = arith.constant 0 : index
    %c0_18 = arith.constant 0 : index
    %20 = vector.load %arg9[%c0_17, %c0_18] : memref<8x128xf32, #tpu.memory_space<vmem>>, vector<8x128xf32>
    tpu.vector_store %arg9[%c0_17, %c0_18], %19 {strides = array<i32>} : memref<8x128xf32, #tpu.memory_space<vmem>>, vector<8x128xf32>,
    return
  }
  func.func @transform_0(%arg0: i32) -> (i32, i32) {
    %c0_i32 = arith.constant 0 : i32
    %c0_i32_0 = arith.constant 0 : i32
    return %arg0, %c0_i32 : i32, i32
  }
  func.func @transform_1(%arg0: i32) -> (i32, i32) {
    %c0_i32 = arith.constant 0 : i32
    %c0_i32_0 = arith.constant 0 : i32
    return %arg0, %c0_i32 : i32, i32
  }
  func.func @transform_2(%arg0: i32) -> (i32, i32) {
    %c0_i32 = arith.constant 0 : i32
    %c0_i32_0 = arith.constant 0 : i32
    %c0_i32_1 = arith.constant 0 : i32
    return %c0_i32, %c0_i32_0 : i32, i32
  }
  func.func @transform_3(%arg0: i32) -> (i32, i32) {
    %c0_i32 = arith.constant 0 : i32
    %c0_i32_0 = arith.constant 0 : i32
    %c0_i32_1 = arith.constant 0 : i32
    return %c0_i32, %c0_i32_0 : i32, i32
  }
  func.func @transform_4(%arg0: i32) -> (i32, i32) {
    %c0_i32 = arith.constant 0 : i32
    %c0_i32_0 = arith.constant 0 : i32
    %c0_i32_1 = arith.constant 0 : i32
    return %c0_i32, %c0_i32_0 : i32, i32
  }
  func.func @transform_5(%arg0: i32) -> (i32, i32) {
    %c0_i32 = arith.constant 0 : i32
    %c0_i32_0 = arith.constant 0 : i32
    %c0_i32_1 = arith.constant 0 : i32
    return %c0_i32, %c0_i32_0 : i32, i32
  }
  func.func @transform_6(%arg0: i32) -> (i32, i32) {
    %c0_i32 = arith.constant 0 : i32
    %c0_i32_0 = arith.constant 0 : i32
    %c0_i32_1 = arith.constant 0 : i32
    return %c0_i32, %c0_i32_0 : i32, i32
  }
  func.func @transform_7(%arg0: i32) -> (i32, i32) {
    %c0_i32 = arith.constant 0 : i32
    %c0_i32_0 = arith.constant 0 : i32
    %c0_i32_1 = arith.constant 0 : i32
    return %c0_i32, %c0_i32_0 : i32, i32
  }
  func.func @transform_8(%arg0: i32) -> (i32, i32) {
    %c0_i32 = arith.constant 0 : i32
    %c0_i32_0 = arith.constant 0 : i32
    return %arg0, %c0_i32 : i32, i32
  }
}

</mosaic_0001>

<bundles_post_ra>
// kernel: physi_vital_forward.1
= control target key start
LH: loop header
LB: loop body
LE: loop exit
PB: predicated region body
PF: predicated region fallthrough
CT: control target
= control target key end

     0   :  { %vm49_vm0 = vcmask 1043456   ;;  %s380_s0 = inlined_call_operand.vmem [shape: f32[8,76], index: 0, kind: input, shape index: {}]   ;;  %s381_s1 = inlined_call_operand.vmem [shape: f32[8,128], index: 1, kind: input, shape index: {}]   ;;  %s382_s2 = inlined_call_operand.vmem [shape: f32[76,32], index: 2, kind: input, shape index: {}]   ;;  %s383_s3 = inlined_call_operand.vmem [shape: f32[1,32], index: 3, kind: input, shape index: {}]   ;;  %s384_s4 = inlined_call_operand.vmem [shape: f32[128,32], index: 4, kind: input, shape index: {}]   ;;  %s385_s5 = inlined_call_operand.vmem [shape: f32[1,32], index: 5, kind: input, shape index: {}]   ;;  %s386_s6 = inlined_call_operand.vmem [shape: f32[64,128], index: 6, kind: input, shape index: {}]   ;;  %s387_s7 = inlined_call_operand.vmem [shape: f32[1,128], index: 7, kind: input, shape index: {}]   ;;  %s388_s8 = inlined_call_operand.hbm [shape: f32[8,128], index: 8, kind: output, shape index: {}]  }
   0x1   :  { %v90_v0 = vld [vmem:[%s384_s4 + $0x78] sm:$0xff]  ;;  %v89_v1 = vld [vmem:[%s384_s4 + $0x70] sm:$0xff]  ;;  %v88_v2 = vld [vmem:[%s384_s4 + $0x68] sm:$0xff] }
   0x2   :  { %95 = vmatpush.msra.mxu1 %v90_v0  ;;  %v87_v3 = vld [vmem:[%s384_s4 + $0x60] sm:$0xff]  ;;  %v40_v4 = vld [vmem:[%s382_s2 + $0x48] sm:$0xf]  ;;  %v86_v5 = vld [vmem:[%s384_s4 + $0x58] sm:$0xff] }
   0x3   :  { %175 = vmatpush.msk.msra.mxu0 %vm49_vm0, %v40_v4  ;;  %v39_v6 = vld [vmem:[%s382_s2 + $0x40] sm:$0xff]  ;;  %v38_v7 = vld [vmem:[%s382_s2 + $0x38] sm:$0xff]  ;;  %v85_v8 = vld [vmem:[%s384_s4 + $0x50] sm:$0xff] }
   0x4   :  { %96 = vmatpush.msra.mxu1 %v89_v1  ;;  %v84_v9 = vld [vmem:[%s384_s4 + $0x48] sm:$0xff]  ;;  %v37_v10 = vld [vmem:[%s382_s2 + $0x30] sm:$0xff] }
   0x5   :  { %60 = vmatpush.msra.mxu0 %v39_v6 }
   0x6   :  { %97 = vmatpush.msra.mxu1 %v88_v2 }
   0x7   :  { %61 = vmatpush.msra.mxu0 %v38_v7 }
   0x8   :  { %98 = vmatpush.msra.mxu1 %v87_v3 }
   0xa   :  { %99 = vmatpush.msra.mxu1 %v86_v5 }
   0xb   :  { %13 = vsyncpa [#allocation3], 0  ;;  %v36_v11 = vld [vmem:[%s382_s2 + $0x28] sm:$0xff]  ;;  %v83_v12 = vld [vmem:[%s384_s4 + $0x40] sm:$0xff]  ;;  %62 = vmatpush.msra.mxu0 %v37_v10  ;;  %vm45_vm1 = vcmask 621568   ;;  %s213_s29 = smov 32  }
   0xc   :  { %100 = vmatpush.msra.mxu1 %v85_v8  ;;  %v35_v13 = vld [vmem:[%s382_s2 + $0x20] sm:$0xff]  ;;  %v82_v14 = vld [vmem:[%s384_s4 + $0x38] sm:$0xff]  ;;  %v81_v16 = vld [vmem:[%s384_s4 + $0x30] sm:$0xff]  ;;  %vm120_vm2 = vcmask 261120   ;;  %vm134_vm3 = vcmask 523264   ;;  %s214_s12 = smov [#allocation2]  }
   0xd   :  { %63 = vmatpush.msra.mxu0 %v36_v11  ;;  %v34_v15 = vld [vmem:[%s382_s2 + $0x18] sm:$0xff]  ;;  %v33_v17 = vld [vmem:[%s382_s2 + $0x10] sm:$0xff]  ;;  %v80_v18 = vld [vmem:[%s384_s4 + $0x28] sm:$0xff]  ;;  %s166_s14 = sshll.u32 %s388_s8, 4  ;;  %s167_s14 = int_to_ptr.hbm [resolvable:$true] %s166_s14 }
   0xe   :  { %101 = vmatpush.msra.mxu1 %v84_v9  ;;  %v32_v19 = vld [vmem:[%s382_s2 + $0x8] sm:$0xff]  ;;  %v79_v20 = vld [vmem:[%s384_s4 + $0x20] sm:$0xff]  ;;  %v78_v22 = vld [vmem:[%s384_s4 + $0x18] sm:$0xff] }
   0xf   :  { %64 = vmatpush.msra.mxu0 %v35_v13  ;;  %v31_v21 = vld [vmem:[%s382_s2] sm:$0xff]  ;;  %v77_v24 = vld [vmem:[%s384_s4 + $0x10] sm:$0xff]  ;;  %v76_v25 = vld [vmem:[%s384_s4 + $0x8] sm:$0xff] }
  0x10   :  { %102 = vmatpush.msra.mxu1 %v83_v12  ;;  %v30_v23 = vld [vmem:[%s380_s0] sm:$0xff]  ;;  %v129_v28 = vld [vmem:[%s386_s6 + $0x38] sm:$0xff]  ;;  %v128_v29 = vld [vmem:[%s386_s6 + $0x30] sm:$0xff] }
  0x11   :  { %65 = vmatpush.msra.mxu0 %v34_v15  ;;  %v75_v26 = vld [vmem:[%s384_s4] sm:$0xff]  ;;  %146 = vmatpush.msra.mxu2 %v129_v28  ;;  %v127_v30 = vld [vmem:[%s386_s6 + $0x28] sm:$0xff]  ;;  %v125_v32 = vld [vmem:[%s386_s6 + $0x18] sm:$0xff] }
  0x12   :  { %103 = vmatpush.msra.mxu1 %v82_v14  ;;  %v74_v27 = vld [vmem:[%s381_s1] sm:$0xff]  ;;  %v124_v33 = vld [vmem:[%s386_s6 + $0x10] sm:$0xff]  ;;  %v123_v34 = vld [vmem:[%s386_s6 + $0x8] sm:$0xff] }
  0x13   :  { %66 = vmatpush.msra.mxu0 %v33_v17  ;;  %147 = vmatpush.msra.mxu2 %v128_v29  ;;  %v126_v31 = vld [vmem:[%s386_s6 + $0x20] sm:$0xff] }
  0x14   :  { %104 = vmatpush.msra.mxu1 %v81_v16  ;;  %v180_v35 = vld [vmem:[%s385_s5] ss:$0 sm:$0xff] }
  0x15   :  { %67 = vmatpush.msra.mxu0 %v32_v19  ;;  %148 = vmatpush.msra.mxu2 %v127_v30  ;;  %v122_v39 = vld [vmem:[%s386_s6] sm:$0xff]  ;;  %s164_s6 = sshll.u32 %s214_s12, 4  ;;  %s165_s6 = int_to_ptr.vmem [resolvable:$true] %s164_s6 }
  0x16   :  { %105 = vmatpush.msra.mxu1 %v80_v18  ;;  %v181_v40 = vld [vmem:[%s383_s3] ss:$0 sm:$0xff] }
  0x17   :  { %68 = vmatpush.msra.mxu0 %v31_v21  ;;  %149 = vmatpush.msra.mxu2 %v126_v31  ;;  %v182_v46 = vld [vmem:[%s387_s7] ss:$0 sm:$0xff] }
  0x18   :  { %106 = vmatpush.msra.mxu1 %v79_v20  ;;  %176 = vmatmul.msk.f32.vlgmr.msra.gmra.mxu0 %vm45_vm1, %v30_v23 }
  0x19   :  { %150 = vmatpush.msra.mxu2 %v125_v32 }
  0x1a   :  { %107 = vmatpush.msra.mxu1 %v78_v22 }
  0x1b   :  { %151 = vmatpush.msra.mxu2 %v124_v33 }
  0x1c   :  { %108 = vmatpush.msra.mxu1 %v77_v24 }
  0x1d   :  { %152 = vmatpush.msra.mxu2 %v123_v34 }
  0x1e   :  { %109 = vmatpush.msra.mxu1 %v76_v25 }
  0x1f   :  { %153 = vmatpush.msra.mxu2 %v122_v39 }
  0x20   :  { %110 = vmatpush.msra.mxu1 %v75_v26 }
  0x21   :  { %111 = vmatmul.f32.vlgmr.msra.gmra.mxu1 %v74_v27 }
  0x95   :  { %v70_v41 = vpop.f32.mrf.mxu0 }
  0x96   :  { %v71_v42 = vadd.f32 %v181_v40, %v70_v41 }
  0x9e   :  { %v112_v36 = vpop.f32.mrf.mxu1 }
  0x9f   :  { %v113_v37 = vadd.f32 %v180_v35, %v112_v36 }
  0xa1   :  { %183 = vtanh.f32 %v113_v37 }
  0xa2   :  { %185 = vtanh.f32 %v71_v42 }
  0xa7   :  { %v184_v38 = vpop.eup %183 }
  0xa8   :  { %117 = vrot.lane.b32.xlu0 %v184_v38, %s213_s29  ;;  %v186_v43 = vpop.eup %185 }
 0x11a   :  { %v118_v44 = vpop.permute.xlu0 %117 }
 0x11b   :  { %v121_v45 = vsel %vm120_vm2, %v186_v43, %v118_v44 }
 0x11c   :  { %177 = vmatmul.msk.f32.vlgmr.msra.gmra.mxu2 %vm134_vm3, %v121_v45 }
 0x19f   :  { %v155_v47 = vpop.f32.mrf.mxu2 }
 0x1a0   :  { %v156_v48 = vadd.f32 %v182_v46, %v155_v47 }
 0x1a2   :  { %158 = vst [vmem:[#allocation2] sm:$0xff] %v156_v48 }
 0x1a3   :  { %169 = dma.vmem_to_hbm [thread:$0]  %s165_s6, 128, %s167_s14, [#allocation3]  }
 0x1a4   :  { %211 = dma.done.wait [#allocation3], 128  }
 0x1a5   :  { %212 = vsyncadd [#allocation3], 4294967168 }
 0x1a6   :  { %174 = vsyncpa [#allocation3], 1 }

</bundles_post_ra>
